<compile_context>
chip_gen: v5e
topology: v5e:2x2
jax: 0.10.0
libtpu: 0.0.40
codegen_flags: <defaults>
</compile_context>

<pallas_src>
import math

import jax
import jax.numpy as jnp
from jax import lax
from jax.experimental import pallas as pl
from jax.experimental.pallas import tpu as pltpu


def _vl_align_kernel(xq_ref,    # VMEM (A, H+1)   visual queries + constant-1 lane
                     embT_ref,  # VMEM (D, tL)    language feats, transposed, L-padded
                     wtT_ref,   # VMEM (H+1, D)   [W * 0.5/exp(log_scale) ; bias_lang]
                     lb_ref,    # VMEM (H+1, 1)   [b / exp(log_scale) ; bias0]
                     out_ref):  # VMEM (A, tL)
    embT = embT_ref[...]                                      # (D, tL)

    # Per-token L2-normalisation scale (applied AFTER the matmul, EUP rsqrt).
    e32 = embT.astype(jnp.float32)
    ssq = jnp.sum(e32 * e32, axis=0, keepdims=True)           # (1, tL)
    inv_norm = lax.rsqrt(jnp.maximum(ssq, 1e-24))             # (1, tL)

    # Augmented text projection, canonical (M,K)x(K,N) on the MXU.
    raw = jnp.dot(wtT_ref[...], embT,
                  preferred_element_type=jnp.float32)         # (H+1, tL)
    tok = raw * inv_norm + lb_ref[...]                        # (H+1, tL) f32

    # logits = x_aug @ tok, also canonical; the constant-1 lane of x_aug picks
    # up the folded token-bias row (no separate broadcast add).
    q = xq_ref[...]                                           # (A, H+1)
    logits = jnp.dot(q, tok.astype(q.dtype),
                     preferred_element_type=jnp.float32)      # (A, tL)

    # CLAMP_DOT_PRODUCT
    out_ref[...] = jnp.clip(logits, -50000.0, 50000.0).astype(out_ref.dtype)


def vl_align(x, embedding, w_text, b_text, bias_lang, log_scale, bias0,
             *, l_tile=512, use_bf16_inputs=False, out_dtype=jnp.float32):
    """
    x:         (bs, A, H)  visual queries
    embedding: (bs, L, D)  language features
    w_text:    (H, D)      nn.Linear weight
    b_text:    (H,)        nn.Linear bias
    bias_lang: (D,)
    log_scale, bias0: scalars (python floats or 0/1-element arrays; traceable)
    returns:   (bs, A, L)  out_dtype (default float32)
    """
    x = jnp.asarray(x, jnp.float32)
    embedding = jnp.asarray(embedding, jnp.float32)
    bs, A, H = x.shape
    _, L, D = embedding.shape
    Hp1 = H + 1

    inv_scale = jnp.exp(-jnp.asarray(log_scale, jnp.float32).reshape(()))
    bias0 = jnp.asarray(bias0, jnp.float32).reshape((1,))

    # Augmented, pre-scaled text projection (wrapper-side, traceable):
    #   wtT[:H] = W * 0.5/exp(log_scale),  wtT[H] = bias_lang (unscaled)
    #   lb[:H]  = b / exp(log_scale),      lb[H]  = bias0
    w = jnp.asarray(w_text, jnp.float32)
    wtT = jnp.concatenate(
        [w * (0.5 * inv_scale), jnp.asarray(bias_lang, jnp.float32)[None, :]],
        axis=0)                                                      # (H+1, D)
    lb = jnp.concatenate(
        [jnp.asarray(b_text, jnp.float32) * inv_scale, bias0],
        axis=0)[:, None]                                             # (H+1, 1)

    # Visual queries with a constant-1 lane appended for the folded bias.
    xq = jnp.pad(x, ((0, 0), (0, 0), (0, 1)), constant_values=1.0)   # (bs, A, H+1)

    # Text features as (bs, D, Lp): both in-kernel matmuls become canonical and
    # the text operand's lane dim is the 128-padded L (dense vregs, dense vst).
    Lp = ((L + 127) // 128) * 128
    embT = jnp.swapaxes(embedding, 1, 2)                             # (bs, D, L)
    if Lp != L:
        embT = jnp.pad(embT, ((0, 0), (0, 0), (0, Lp - L)))

    # L-tile: a multiple of 128 that divides Lp.  Default 512 keeps the
    # per-step double-buffered blocks (embT + out + xq) to a few MiB of VMEM at
    # production sizes (D=H=256, A~300) -- safe for v7x's 32 MiB scoped default
    # -- while leaving multiple grid steps for pipelining / megacore.
    tL = min(Lp, max(128, (int(l_tile) // 128) * 128))
    while Lp % tL:
        tL -= 128

    in_dtype = jnp.bfloat16 if use_bf16_inputs else jnp.float32
    xq = xq.astype(in_dtype)       # bf16 option halves DMA bytes (mem-bound)
    embT = embT.astype(in_dtype)
    wtT = wtT.astype(in_dtype)
    # lb stays f32: added after the f32 accumulation.

    grid = (bs, Lp // tL)
    out = pl.pallas_call(
        _vl_align_kernel,
        out_shape=jax.ShapeDtypeStruct((bs, A, Lp), out_dtype),
        grid=grid,
        in_specs=[
            # xq depends only on b -> stays resident across the inner L tiles.
            pl.BlockSpec((None, A, Hp1), lambda b, l: (b, 0, 0)),
            pl.BlockSpec((None, D, tL), lambda b, l: (b, 0, l)),
            # Weights: constant index maps -> DMA'd once, resident.
            pl.BlockSpec((Hp1, D), lambda b, l: (0, 0)),
            pl.BlockSpec((Hp1, 1), lambda b, l: (0, 0)),
        ],
        out_specs=pl.BlockSpec((None, A, tL), lambda b, l: (b, 0, l)),
        compiler_params=pltpu.CompilerParams(
            dimension_semantics=("parallel", "parallel")),
    )(xq, embT, wtT, lb)

    # Padded text columns hold finite garbage (q . lb); slice them off here.
    return out[:, :, :L]


def vl_align_ref(x, embedding, w_text, b_text, bias_lang, log_scale, bias0):
    """Pure-JAX reference mirroring the PyTorch forward."""
    emb = embedding / jnp.maximum(
        jnp.linalg.norm(embedding, axis=-1, keepdims=True), 1e-12)
    tokens = jnp.einsum("bld,hd->blh", emb / 2.0, w_text) + b_text
    tok_bias = jnp.einsum("bld,d->bl", emb, bias_lang) + bias0
    A = x.shape[1]
    bias = jnp.broadcast_to(tok_bias[:, None, :],
                            (x.shape[0], A, emb.shape[1]))
    logits = (jnp.einsum("bah,blh->bal", x, tokens)
              / jnp.exp(jnp.asarray(log_scale, jnp.float32)) + bias)
    return jnp.clip(logits, -50000.0, 50000.0)


if __name__ == "__main__":
    # Config-equivalent constants (deterministic, synthetic).
    PRIOR_PROB = 0.01
    LOG_SCALE = 0.0
    DIM_PROJ = 32      # cfg.MODEL.DIM_PROJ
    HIDDEN_DIM = 32    # cfg.MODEL.MaskDINO.HIDDEN_DIM
    BS, A, L = 2, 16, 8

    bias0 = -math.log((1.0 - PRIOR_PROB) / PRIOR_PROB)

    key = jax.random.PRNGKey(0)
    kx, ke, kw, kb = jax.random.split(key, 4)
    x = jax.random.normal(kx, (BS, A, HIDDEN_DIM), jnp.float32)
    embedding = jax.random.normal(ke, (BS, L, DIM_PROJ), jnp.float32)
    w_text = jax.random.normal(kw, (HIDDEN_DIM, DIM_PROJ), jnp.float32) * 0.05
    b_text = jax.random.normal(kb, (HIDDEN_DIM,), jnp.float32) * 0.05
    bias_lang = jnp.zeros((DIM_PROJ,), jnp.float32)  # nn.Parameter(torch.zeros)

    # Default f32 path (use_bf16_inputs=True / out_dtype=bf16 are the fast,
    # looser-tolerance options for mem-bound production shapes).
    out = vl_align(x, embedding, w_text, b_text, bias_lang, LOG_SCALE, bias0)
    out = jax.block_until_ready(out)

    ref = vl_align_ref(x, embedding, w_text, b_text, bias_lang, LOG_SCALE, bias0)
    assert out.shape == (BS, A, L), out.shape
    assert jnp.allclose(out, ref, atol=1e-4, rtol=1e-4), float(
        jnp.max(jnp.abs(out - ref)))

    print("KERNEL_OK")
</pallas_src>

<mosaic_0001>
module attributes {stable_mosaic.version = 11 : i64} {
  func.func @_vl_align_kernel(%arg0: i32, %arg1: i32, %arg2: memref<1x16x33xf32, #tpu.memory_space<vmem>>, %arg3: memref<1x32x128xf32, #tpu.memory_space<vmem>>, %arg4: memref<33x32xf32, #tpu.memory_space<vmem>>, %arg5: memref<33x1xf32, #tpu.memory_space<vmem>>, %arg6: memref<1x16x128xf32, #tpu.memory_space<vmem>>) attributes {dimension_semantics = [#tpu.dimension_semantics<parallel>, #tpu.dimension_semantics<parallel>], iteration_bounds = array<i64: 2, 1>, scalar_prefetch = 0 : i64, scratch_operands = 0 : i64, tpu.core_type = #tpu.core_type<tc>, window_params = [{transform_indices = @transform_0, window_bounds = array<i64: 1, 16, 33>}, {transform_indices = @transform_1, window_bounds = array<i64: 1, 32, 128>}, {pipeline_mode = #tpu.pipeline_mode<synchronous>, transform_indices = @transform_2, window_bounds = array<i64: 33, 32>}, {pipeline_mode = #tpu.pipeline_mode<synchronous>, transform_indices = @transform_3, window_bounds = array<i64: 33, 1>}, {transform_indices = @transform_4, window_bounds = array<i64: 1, 16, 128>}]} {
    %c0 = arith.constant 0 : index
    %c0_0 = arith.constant 0 : index
    %c0_1 = arith.constant 0 : index
    %0 = vector.load %arg3[%c0, %c0_0, %c0_1] : memref<1x32x128xf32, #tpu.memory_space<vmem>>, vector<1x32x128xf32>
    %1 = vector.shape_cast %0 : vector<1x32x128xf32> to vector<32x128xf32>
    %2 = arith.mulf %1, %1 : vector<32x128xf32>
    %cst = arith.constant dense<0.000000e+00> : vector<128xf32>
    %3 = vector.multi_reduction <add>, %2, %cst [0] : vector<32x128xf32> to vector<128xf32>
    %4 = vector.shape_cast %3 : vector<128xf32> to vector<1x128xf32>
    %cst_2 = arith.constant 1.000000e-24 : f32
    %5 = vector.broadcast %cst_2 : f32 to vector<1x128xf32>
    %6 = arith.maximumf %4, %5 : vector<1x128xf32>
    %7 = math.rsqrt %6 : vector<1x128xf32>
    %c0_3 = arith.constant 0 : index
    %c0_4 = arith.constant 0 : index
    %8 = vector.load %arg4[%c0_3, %c0_4] : memref<33x32xf32, #tpu.memory_space<vmem>>, vector<33x32xf32>
    %cst_5 = arith.constant dense<0.000000e+00> : vector<33x128xf32>
    %9 = tpu.matmul %8, %1, %cst_5 {dimension_numbers = #tpu.dot_dimension_numbers<[1], [0], [0], [1], [0, 0, 1, 1], [], []>} : vector<33x32xf32>, vector<32x128xf32>, vector<33x128xf32> -> vector<33x128xf32>
    %10 = vector.broadcast %7 : vector<1x128xf32> to vector<33x128xf32>
    %11 = arith.mulf %9, %10 : vector<33x128xf32>
    %c0_6 = arith.constant 0 : index
    %c0_7 = arith.constant 0 : index
    %12 = vector.load %arg5[%c0_6, %c0_7] : memref<33x1xf32, #tpu.memory_space<vmem>>, vector<33x1xf32>
    %13 = vector.broadcast %12 : vector<33x1xf32> to vector<33x128xf32>
    %14 = arith.addf %11, %13 : vector<33x128xf32>
    %c0_8 = arith.constant 0 : index
    %c0_9 = arith.constant 0 : index
    %c0_10 = arith.constant 0 : index
    %15 = vector.load %arg2[%c0_8, %c0_9, %c0_10] : memref<1x16x33xf32, #tpu.memory_space<vmem>>, vector<1x16x33xf32>
    %16 = vector.shape_cast %15 : vector<1x16x33xf32> to vector<16x33xf32>
    %cst_11 = arith.constant dense<0.000000e+00> : vector<16x128xf32>
    %17 = tpu.matmul %16, %14, %cst_11 {dimension_numbers = #tpu.dot_dimension_numbers<[1], [0], [0], [1], [0, 0, 1, 1], [], []>} : vector<16x33xf32>, vector<33x128xf32>, vector<16x128xf32> -> vector<16x128xf32>
    %cst_12 = arith.constant -5.000000e+04 : f32
    %cst_13 = arith.constant 5.000000e+04 : f32
    %18 = vector.broadcast %cst_12 : f32 to vector<16x128xf32>
    %19 = arith.maximumf %18, %17 : vector<16x128xf32>
    %20 = vector.broadcast %cst_13 : f32 to vector<16x128xf32>
    %21 = arith.minimumf %20, %19 : vector<16x128xf32>
    %c0_14 = arith.constant 0 : index
    %c0_15 = arith.constant 0 : index
    %c0_16 = arith.constant 0 : index
    %22 = vector.load %arg6[%c0_14, %c0_15, %c0_16] : memref<1x16x128xf32, #tpu.memory_space<vmem>>, vector<1x16x128xf32>
    %23 = vector.shape_cast %22 : vector<1x16x128xf32> to vector<16x128xf32>
    %24 = vector.shape_cast %21 : vector<16x128xf32> to vector<1x16x128xf32>
    tpu.vector_store %arg6[%c0_14, %c0_15, %c0_16], %24 {strides = array<i32>} : memref<1x16x128xf32, #tpu.memory_space<vmem>>, vector<1x16x128xf32>,
    return
  }
  func.func @transform_0(%arg0: i32, %arg1: i32) -> (i32, i32, i32) {
    %c0_i32 = arith.constant 0 : i32
    %c0_i32_0 = arith.constant 0 : i32
    %c0_i32_1 = arith.constant 0 : i32
    return %arg0, %c0_i32, %c0_i32_0 : i32, i32, i32
  }
  func.func @transform_1(%arg0: i32, %arg1: i32) -> (i32, i32, i32) {
    %c0_i32 = arith.constant 0 : i32
    %c0_i32_0 = arith.constant 0 : i32
    return %arg0, %c0_i32, %arg1 : i32, i32, i32
  }
  func.func @transform_2(%arg0: i32, %arg1: i32) -> (i32, i32) {
    %c0_i32 = arith.constant 0 : i32
    %c0_i32_0 = arith.constant 0 : i32
    %c0_i32_1 = arith.constant 0 : i32
    return %c0_i32, %c0_i32_0 : i32, i32
  }
  func.func @transform_3(%arg0: i32, %arg1: i32) -> (i32, i32) {
    %c0_i32 = arith.constant 0 : i32
    %c0_i32_0 = arith.constant 0 : i32
    %c0_i32_1 = arith.constant 0 : i32
    return %c0_i32, %c0_i32_0 : i32, i32
  }
  func.func @transform_4(%arg0: i32, %arg1: i32) -> (i32, i32, i32) {
    %c0_i32 = arith.constant 0 : i32
    %c0_i32_0 = arith.constant 0 : i32
    return %arg0, %c0_i32, %arg1 : i32, i32, i32
  }
}

</mosaic_0001>

<bundles_post_ra>
// kernel: tpu_custom_call.1
= control target key start
LH: loop header
LB: loop body
LE: loop exit
PB: predicated region body
PF: predicated region fallthrough
CT: control target
= control target key end

     0   :  { %9 = vsyncpa [#allocation3], 0  ;;  %s857_s0 = inlined_call_operand.vmem [shape: f32[2,16,33], index: 0, kind: input, shape index: {}]   ;;  %s858_s1 = inlined_call_operand.vmem [shape: f32[2,32,128], index: 1, kind: input, shape index: {}]   ;;  %s859_s2 = inlined_call_operand.vmem [shape: f32[33,32], index: 2, kind: input, shape index: {}]   ;;  %s860_s3 = inlined_call_operand.vmem [shape: f32[33,1], index: 3, kind: input, shape index: {}]   ;;  %s861_s4 = inlined_call_operand.hbm [shape: f32[2,16,128], index: 4, kind: output, shape index: {}]  }
   0x1   :  { %11 = vsyncpa [#allocation3 + $0x1], 0  ;;  %s718_s15 = smov 0   ;;  %s720_s16 = smov 0  }
   0x2   :  { %s722_s17 = smov 0   ;;  %s724_s18 = smov 0  }
   0x3   :  { %s726_s19 = smov 0   ;;  %s728_s20 = smov 0  }
   0x4 LB: > { %s511_s21 = sadd.s32 4294967295, %s688_s20   ;;  %s512_s22 = sadd.s32 4294967294, %s688_s20   ;;  %s688_s20 = sphi %s728_s20, %s17_s20   ;;  %s684_s19 = sphi %s726_s19, %s868_s19   ;;  %s680_s18 = sphi %s724_s18, %s867_s18   ;;  %s676_s17 = sphi %s722_s17, %s866_s17   ;;  %s672_s16 = sphi %s720_s16, %s865_s16   ;;  %s668_s15 = sphi %s718_s15, %s864_s15  }
   0x5   : > { %s29_s23 = sadd.s32 1, %s684_s19  ;;  %s134_s24 = sadd.s32 1, %s676_s17 }
   0x6   : > { %p31_p0 = scmp.ge.s32.totalorder %s29_s23, 2  ;;  %p144_p1 = scmp.ne.s32.totalorder %s676_s17, %s672_s16 }
   0x7   : > { %p145_p2 = scmp.eq.s32.totalorder %s511_s21, 1  ;;  %p150_p3 = scmp.ne.s32.totalorder %s672_s16, %s668_s15 }
   0x8   : > { %s870_s23 = smov (%p31_p0, %s29_s23), 0  ;;  %p151_p5 = scmp.eq.s32.totalorder %s512_s22, 1 }
   0x9   : > { %p758_p4 = por %p145_p2, %p144_p1  ;;  %s129_s26 = ssub.s32 %s684_s19, %s870_s23 }
   0xa   : > { %p515_p6 = scmp.ge.s32.totalorder %s688_s20, 1  ;;  %p132_p7 = scmp.eq.s32.totalorder %s129_s26, 0 }
   0xb   : > { %p765_p8 = por %p151_p5, %p150_p3  ;;  %p194_p9 = scmp.lt.s32.totalorder %s688_s20, 3 }
   0xc   : > { %s771_s28 = scalar_select %p132_p7, %s676_s17, %s134_s24  }
   0xd   : > { %p195_p10 = pnand %p515_p6, %p194_p9 }
   0xe   : > { %p228_p11 = scmp.lt.s32.totalorder (!%p195_p10), %s680_s18, 1  ;;  %s538_s26 = sshll.u32 (!%p195_p10), %s680_s18, 4 }
   0xf   : > { %198 = sbr.rel (%p195_p10) target bundleno = 325 (0x145), region = 36  ;;  %s417_s6 = scalar_lea.hbm (!%p195_p10), %s861_s4, %s538_s26 }
  0x10   : > { %s420_s9 = sshll.u32 (!%p195_p10), %s417_s6, 4  ;;  %s630_s14 = scalar_lea.hbm (!%p195_p10), %s861_s4, 32  ;;  %s421_s9 = int_to_ptr.hbm [resolvable:$true] %s420_s9 }
  0x11   : > { %s624_s11 = sshra.s32 (!%p195_p10), %s421_s9, 4  ;;  %s625_s11 = int_to_ptr.hbm [resolvable:$true] %s624_s11 }
  0x12   : > { %p631_p1 = scmp.lt.s32.totalorder (!%p195_p10), %s625_s11, %s861_s4 }
  0x14   : > { %v690_v0 = vmov 0   ;;  %v331_v1 = vld [vmem:[%s860_s3 + $0x20] sm:$0x1]  ;;  %s778_s5 = scalar_select %p228_p11, %s680_s18, 1  ;;  %v329_v2 = vld [vmem:[%s860_s3 + $0x10] sm:$0xff]  ;;  %v330_v9 = vld [vmem:[%s860_s3 + $0x18] sm:$0xff] }
  0x15   : > { %605 = vset.pattern.permute.xlu0 %v690_v0  ;;  %606 = vset.pattern.permute.xlu1 %v690_v0  ;;  %v327_v3 = vld [vmem:[%s860_s3] sm:$0xff]  ;;  %v328_v12 = vld [vmem:[%s860_s3 + $0x8] sm:$0xff]  ;;  %v272_v15 = vld [vmem:[%s859_s2 + $0x18] sm:$0xff]  ;;  %vm274_vm0 = vcmask 261120   ;;  %vm371_vm4 = vcmask 1040384   ;;  %vm364_vm5 = vcmask 269312  }
  0x16   : > { %354 = vperm.xlu0 %605, %v331_v1   ;;  %607 = vset.pattern.permute.xlu2 %v690_v0  ;;  %s537_s10 = sshll.u32 %s778_s5, 5  ;;  %v269_v16 = vld [vmem:[%s859_s2] sm:$0xff]  ;;  %v271_v18 = vld [vmem:[%s859_s2 + $0x10] sm:$0xff]  ;;  %v270_v21 = vld [vmem:[%s859_s2 + $0x8] sm:$0xff]  ;;  %s626_s18 = scalar_lea.hbm %s625_s11, 16 }
  0x17   : > { %344 = vperm.xlu1 %606, %v329_v2   ;;  %334 = vperm.xlu2 %607, %v327_v3   ;;  %s240_s13 = scalar_lea.vmem %s858_s1, %s537_s10  ;;  %v273_v20 = vld [vmem:[%s859_s2 + $0x20] sm:$0x1]  ;;  %p627_p12 = scmp.ne.s32.totalorder %s625_s11, %s626_s18 }
  0x18   : > { %v244_v4 = vld [vmem:[%s240_s13 + $0x18] sm:$0xff]  ;;  %v243_v5 = vld [vmem:[%s240_s13 + $0x10] sm:$0xff]  ;;  %v242_v6 = vld [vmem:[%s240_s13 + $0x8] sm:$0xff]  ;;  %p632_p2 = scmp.lt.s32.totalorder %s630_s14, %s626_s18 }
  0x19   : > { %540 = vmatpush.msra.mxu3 %v244_v4  ;;  %302 = vmatpush.msra.mxu0 %v244_v4  ;;  %v246_v7 = vmul.f32 %v242_v6, %v242_v6  ;;  %v241_v8 = vld [vmem:[%s240_s13] sm:$0xff]  ;;  %v247_v10 = vmul.f32 %v243_v5, %v243_v5  ;;  %v248_v13 = vmul.f32 %v244_v4, %v244_v4  ;;  %s536_s13 = sshll.u32 %s778_s5, 4  ;;  %s225_s5 = sand.u32 1, %s672_s16  }
  0x1a   : > { %539 = vmatpush.msra.mxu2 %v244_v4  ;;  %v245_v11 = vmul.f32 %v241_v8, %v241_v8  ;;  %s232_s22 = scalar_lea.vmem %s857_s0, %s536_s13  ;;  %s516_s24 = sshll.u32 %s225_s5, 4 }
  0x1b   : > { %542 = vmatpush.msra.mxu3 %v243_v5  ;;  %303 = vmatpush.msra.mxu0 %v243_v5  ;;  %v362_v56 = vld [vmem:[%s232_s22] sm:$0xff]  ;;  %v363_v57 = vld [vmem:[%s232_s22 + $0x8] sm:$0xff]  ;;  %s227_s7 = scalar_lea.vmem [#allocation2], %s516_s24  ;;  %s405_s10 = scalar_lea.sflag [#allocation3], %s225_s5 }
  0x1c   : > { %v249_v14 = vadd.f32 %v246_v7, %v245_v11  ;;  %541 = vmatpush.msra.mxu2 %v243_v5  ;;  %s418_s8 = sshll.u32 %s227_s7, 4  ;;  %p628_p13 = pnand %p627_p12, %p758_p4  ;;  %s419_s8 = int_to_ptr.vmem [resolvable:$true] %s418_s8 }
  0x1d   : > { %544 = vmatpush.msra.mxu3 %v242_v6  ;;  %304 = vmatpush.msra.mxu0 %v242_v6  ;;  %p633_p3 = por %p632_p2, %p631_p1 }
  0x1e   : > { %349 = vperm.xlu0 %605, %v330_v9   ;;  %v250_v17 = vadd.f32 %v249_v14, %v247_v10  ;;  %543 = vmatpush.msra.mxu2 %v242_v6  ;;  %p629_p0 = pneg %p628_p13 }
  0x1f   : > { %339 = vperm.xlu1 %606, %v328_v12   ;;  %546 = vmatpush.msra.mxu3 %v241_v8 }
  0x20   : > { %305 = vmatpush.msra.mxu0 %v241_v8  ;;  %v251_v19 = vadd.f32 %v250_v17, %v248_v13  ;;  %524 = vmatmul.msk.f32.vlgmr.msra.gmra.mxu3 %vm274_vm0, %v272_v15  ;;  %p634_p5 = pnand %p633_p3, %p629_p0 }
  0x21   : > { %521 = vmatmul.msk.f32.vlgmr.msra.gmra.mxu0 %vm274_vm0, %v269_v16  ;;  %545 = vmatpush.msra.mxu2 %v241_v8 }
  0x22   : > { %523 = vmatmul.msk.f32.vlgmr.msra.gmra.mxu2 %vm274_vm0, %v271_v18  ;;  %v252_v22 = vrot.slane %v251_v19, 4 }
  0x24   : > { %v253_v23 = vadd.f32 %v252_v22, %v251_v19 }
  0x26   : > { %v254_v24 = vrot.slane %v253_v23, 2 }
  0x28   : > { %525 = vmatmul.msk.f32.gmra.mxu3 %vm274_vm0, %v273_v20  ;;  %v255_v25 = vadd.f32 %v254_v24, %v253_v23 }
  0x29   : > { %522 = vmatmul.msk.f32.gmra.mxu0 %vm274_vm0, %v270_v21 }
  0x2a   : > { %v256_v26 = vrot.slane %v255_v25, 1 }
  0x2c   : > { %v257_v27 = vadd.f32 %v256_v26, %v255_v25 }
  0x2e   : > { %v258_v28 = vmax.f32 %v257_v27, 1e-24 }
  0x30   : > { %608 = vrsqrt.f32 %v258_v28  ;;  %vm265_vm1 = vweird.f32 %v258_v28 }
  0x36   : > { %v609_v29 = vpop.eup %608 }
  0x37   : > { %v260_v30 = vmul.f32 %v609_v29, %v258_v28  ;;  %vm266_vm2 = vweird.f32 %v609_v29 }
  0x38   : > { %vm267_vm3 = vmor %vm265_vm1, %vm266_vm2 }
  0x39   : > { %v261_v31 = vmul.f32 %v609_v29, %v260_v30 }
  0x3b   : > { %v262_v32 = vmul.f32 0.5, %v261_v31 }
  0x3d   : > { %v263_v33 = vsub.f32 1.5, %v262_v32 }
  0x3f   : > { %v264_v37 = vmul.f32 %v609_v29, %v263_v33 }
  0x41   : > { %v268_v39 = vsel %vm267_vm3, %v609_v29, %v264_v37 }
  0x71   : > { %v335_v53 = vpop.permute.xlu2 %334 }
  0x88   : > { %v355_v34 = vpop.permute.xlu0 %354 }
  0x89   : > { %v345_v38 = vpop.permute.xlu1 %344 }
  0x90   : > { %v350_v44 = vpop.permute.xlu0 %349 }
  0x91   : > { %v340_v50 = vpop.permute.xlu1 %339 }
  0x9e   : > { %v307_v35 = vpop.f32.mrf.mxu0 }
  0x9f   : > { %v322_v51 = vmul.f32 %v307_v35, %v268_v39 }
  0xa1   : > { %v357_v55 = vadd.f32 %v335_v53, %v322_v51 }
  0xa3   : > { %v316_v36 = vpop.f32.mrf.mxu3 }
  0xa4   : > { %v325_v42 = vmul.f32 %v316_v36, %v268_v39 }
  0xa5   : > { %v313_v40 = vpop.f32.mrf.mxu2 }
  0xa6   : > { %v310_v45 = vpop.f32.mrf.mxu0  ;;  %v324_v46 = vmul.f32 %v313_v40, %v268_v39  ;;  %v360_v48 = vadd.f32 %v350_v44, %v325_v42 }
  0xa7   : > { %v323_v49 = vmul.f32 %v310_v45, %v268_v39 }
  0xa8   : > { %v359_v52 = vadd.f32 %v345_v38, %v324_v46 }
  0xa9   : > { %v358_v54 = vadd.f32 %v340_v50, %v323_v49 }
  0xab   : > { %v319_v41 = vpop.f32.mrf.mxu3 }
  0xac   : > { %v326_v43 = vmul.f32 %v319_v41, %v268_v39 }
  0xae   : > { %v361_v47 = vadd.f32 %v355_v34, %v326_v43 }
  0xb0   : > { %526 = vmatpush.msk.msra.mxu1 %vm371_vm4, %v361_v47 }
  0xb2   : > { %387 = vmatpush.msra.mxu1 %v360_v48 }
  0xb4   : > { %388 = vmatpush.msra.mxu1 %v359_v52 }
  0xb6   : > { %389 = vmatpush.msra.mxu1 %v358_v54 }
  0xb8   : > { %390 = vmatpush.msra.mxu1 %v357_v55 }
  0xb9   : > { %527 = vmatmul.msk.f32.vlgmr.msra.gmra.mxu1 %vm364_vm5, %v362_v56 }
  0xc1   : > { %528 = vmatmul.msk.f32.gmra.mxu1 %vm364_vm5, %v363_v57 }
 0x136   : > { %v392_v58 = vpop.f32.mrf.mxu1 }
 0x137   : > { %v529_v59 = vclamps-f32 %v392_v58, 50000.0 }
 0x139   : > { %402 = vst [vmem:[%s227_s7] sm:$0xff] %v529_v59 }
 0x13e   : > { %v395_v60 = vpop.f32.mrf.mxu1 }
 0x13f   : > { %v530_v61 = vclamps-f32 %v395_v60, 50000.0 }
 0x141   : > { %403 = vst [vmem:[%s227_s7 + $0x8] sm:$0xff] %v530_v61 }
 0x142   : > { %637 = shalt.err (!%p634_p5)
}
 0x143   : > { %s691_s5 = smov 128   ;;  %s692_s24 = smov 8  }
 0x144   : > { %547 = dma.vmem_to_hbm [thread:$0]  (%p758_p4), %s419_s8, 256, %s421_s9, %s405_s10, %s691_s5, %s691_s5, %s692_s24  }
 0x145 PF: > { %p553_p6 = scmp.ge.s32.totalorder %s688_s20, 2  ;;  %s435_s26 = sand.u32 1, %s668_s15  }
 0x146   : > { %s436_s29 = scalar_lea.sflag [#allocation3], %s435_s26 }
 0x147   : > { %p550_p7 = pnand %p553_p6, %p765_p8 }
 0x149   : > { %p551_p9 = pneg %p550_p7 }
 0x14b   : > { %663 = dma.done.wait (%p551_p9), %s436_s29, 256  }
 0x14c   : > { %665 = vsyncadd (%p551_p9), %s436_s29, 4294967040  ;;  %s17_s20 = sadd.s32 1, %s688_s20   ;;  %s864_s15 = smov %s672_s16 }
 0x14d   : > { %p14_p10 = scmp.ge.s32.totalorder %s17_s20, 4   ;;  %s865_s16 = smov %s676_s17 }
 0x14e   : > { %s866_s17 = smov %s771_s28  ;;  %s867_s18 = smov %s684_s19 }
 0x14f   : > { %s868_s19 = smov %s870_s23  ;;  %16 = sbr.rel (!%p14_p10) target bundleno = 4 (0x4), region = 74 }
 0x154   :  { %442 = vsyncpa [#allocation3], 1 }
 0x155   :  { %444 = vsyncpa [#allocation3 + $0x1], 1 }

</bundles_post_ra>
